<compile_context>
chip_gen: v6e
topology: v6e:2x2x1
jax: 0.10.0
libtpu: 0.0.40
codegen_flags: <defaults>
</compile_context>

<pallas_src>
import jax
import jax.numpy as jnp
from jax.experimental import pallas as pl
from jax.experimental.pallas import tpu as pltpu


def _timeblock_kernel(x_ref, w_ref, b_ref, o_ref):
    # x_ref: (tm, T, C_in)        unpadded time axis (edges handled below)
    # w_ref: (K*C_in, 3*C_out)    fused [conv1 | conv2 | conv3] im2col weights
    # b_ref: (1, 3*C_out)         fused biases
    # o_ref: (tm*T, C_out)
    tm, t_len, c_in = x_ref.shape
    kc, c3 = w_ref.shape
    k_taps = kc // c_in
    c_out = c3 // 3
    pad = (k_taps - 1) // 2

    x = x_ref[...]

    # im2col along time with zero "same" padding at the edges:
    #   output[t] uses x[t + (k - pad)] for tap k.
    taps = []
    for k in range(k_taps):
        off = k - pad
        if off < 0:
            z = jnp.zeros((tm, -off, c_in), x.dtype)
            xs = jnp.concatenate([z, x[:, :t_len + off, :]], axis=1)
        elif off > 0:
            z = jnp.zeros((tm, off, c_in), x.dtype)
            xs = jnp.concatenate([x[:, off:, :], z], axis=1)
        else:
            xs = x
        taps.append(xs)
    col = jnp.concatenate(taps, axis=-1)          # (tm, T, K*C_in)
    col = col.reshape(tm * t_len, kc)             # collapse leading dims only (layout no-op)

    # Single fused MXU matmul for all three convs and all K taps, f32 accum.
    acc = jnp.dot(col, w_ref[...], preferred_element_type=jnp.float32)
    acc = acc + b_ref[...].astype(jnp.float32)    # (tm*T, 3*C_out)

    a1 = acc[:, :c_out]
    a2 = acc[:, c_out:2 * c_out]
    a3 = acc[:, 2 * c_out:]
    o_ref[...] = jnp.maximum(a1 + jax.nn.sigmoid(a2) + a3, 0.0).astype(o_ref.dtype)


def time_block(x, w, b, *, tm=None):
    """x: (B, N, T, C_in); w: (3, K, C_in, C_out); b: (3, C_out)."""
    B, N, T, C_in = x.shape
    n_conv, K, _, C_out = w.shape
    assert n_conv == 3
    # The PyTorch module fixes padding=(0,1); that is "same" only for K=3.
    assert K == 3, "padding=(0,1) in the reference module is 'same' only for kernel_size=3"
    M = B * N

    # Row-tile selection: big blocks (tm*T MXU rows, large DMAs), comfortably
    # within the default 32 MiB scoped VMEM on all generations (incl. v7x's
    # 64 MiB physical), and >= 2 grid steps so v7x megacore has work per core.
    if tm is None:
        tm = min(M, 512)
        if tm == M and M % 2 == 0 and M >= 16:
            tm = M // 2
    tm = max(8, (min(tm, M) // 8) * 8)      # 8-align so tm*T rows tile cleanly
    num_blocks = pl.cdiv(M, tm)
    M_pad = num_blocks * tm

    x_flat = x.reshape(M, T, C_in)
    if M_pad != M:
        # Ragged tail: pad rows with zeros (no-op when tm divides M).
        x_flat = jnp.pad(x_flat, ((0, M_pad - M), (0, 0), (0, 0)))

    # Fuse the three conv weights (and taps) into one im2col matrix:
    #   w_fused[k*C_in + ci, c*C_out + co] = w[c, k, ci, co]
    w_fused = jnp.transpose(w, (1, 2, 0, 3)).reshape(K * C_in, 3 * C_out)
    b_fused = b.reshape(1, 3 * C_out)

    out = pl.pallas_call(
        _timeblock_kernel,
        out_shape=jax.ShapeDtypeStruct((M_pad * T, C_out), x.dtype),
        grid_spec=pltpu.PrefetchScalarGridSpec(
            num_scalar_prefetch=0,
            grid=(num_blocks,),
            in_specs=[
                pl.BlockSpec((tm, T, C_in), lambda i: (i, 0, 0)),
                pl.BlockSpec((K * C_in, 3 * C_out), lambda i: (0, 0)),
                pl.BlockSpec((1, 3 * C_out), lambda i: (0, 0)),
            ],
            out_specs=pl.BlockSpec((tm * T, C_out), lambda i: (i, 0)),
        ),
        compiler_params=pltpu.CompilerParams(
            dimension_semantics=("parallel",)),
    )(x_flat, w_fused, b_fused)

    out = out.reshape(M_pad, T, C_out)[:M]
    return out.reshape(B, N, T, C_out)


def time_block_ref(x, w, b):
    """Pure-JAX reference mirroring the PyTorch forward (NCHW conv)."""
    Xn = jnp.transpose(x, (0, 3, 1, 2))  # (B, C_in, N, T)

    def conv(c):
        wgt = jnp.transpose(w[c], (2, 1, 0))[:, :, None, :]  # (C_out, C_in, 1, K)
        y = jax.lax.conv_general_dilated(
            Xn, wgt, window_strides=(1, 1),
            padding=((0, 0), (1, 1)),
            dimension_numbers=("NCHW", "OIHW", "NCHW"))
        return y + b[c][None, :, None, None]

    out = jax.nn.relu(conv(0) + jax.nn.sigmoid(conv(1)) + conv(2))
    return jnp.transpose(out, (0, 2, 3, 1))  # (B, N, T, C_out)


if __name__ == "__main__":
    # small shapes implied by the module: batch=2, nodes=16, timesteps=8,
    # in_channels=4, out_channels=32, kernel_size=3
    B, N, T, C_IN, C_OUT, K = 2, 16, 8, 4, 32, 3

    key = jax.random.PRNGKey(0)
    kx, kw, kb = jax.random.split(key, 3)

    x = jax.random.normal(kx, (B, N, T, C_IN), dtype=jnp.float32)
    # deterministic synthetic parameters (3 convs stacked): (3, K, C_in, C_out)
    w = 0.1 * jax.random.normal(kw, (3, K, C_IN, C_OUT), dtype=jnp.float32)
    b = 0.1 * jax.random.normal(kb, (3, C_OUT), dtype=jnp.float32)

    out = time_block(x, w, b)       # auto tile: tm=16 -> grid=(2,) for M=32
    out = jax.block_until_ready(out)

    ref = time_block_ref(x, w, b)
    assert out.shape == (B, N, T, C_OUT)
    assert jnp.allclose(out, ref, atol=1e-4, rtol=1e-4), "mismatch vs reference"

    print("KERNEL_OK")
</pallas_src>

<mosaic_0001>
module attributes {stable_mosaic.version = 11 : i64} {
  func.func @_timeblock_kernel(%arg0: i32, %arg1: memref<16x8x4xf32, #tpu.memory_space<vmem>>, %arg2: memref<12x96xf32, #tpu.memory_space<vmem>>, %arg3: memref<1x96xf32, #tpu.memory_space<vmem>>, %arg4: memref<128x32xf32, #tpu.memory_space<vmem>>) attributes {dimension_semantics = [#tpu.dimension_semantics<parallel>], iteration_bounds = array<i64: 2>, scalar_prefetch = 0 : i64, scratch_operands = 0 : i64, tpu.core_type = #tpu.core_type<tc>, window_params = [{transform_indices = @transform_0, window_bounds = array<i64: 16, 8, 4>}, {pipeline_mode = #tpu.pipeline_mode<synchronous>, transform_indices = @transform_1, window_bounds = array<i64: 12, 96>}, {pipeline_mode = #tpu.pipeline_mode<synchronous>, transform_indices = @transform_2, window_bounds = array<i64: 1, 96>}, {transform_indices = @transform_3, window_bounds = array<i64: 128, 32>}]} {
    %c0 = arith.constant 0 : index
    %c0_0 = arith.constant 0 : index
    %c0_1 = arith.constant 0 : index
    %0 = vector.load %arg1[%c0, %c0_0, %c0_1] : memref<16x8x4xf32, #tpu.memory_space<vmem>>, vector<16x8x4xf32>
    %cst = arith.constant 0.000000e+00 : f32
    %1 = vector.broadcast %cst : f32 to vector<16x1x4xf32>
    %2 = vector.extract_strided_slice %0 {offsets = [0, 0, 0], sizes = [16, 7, 4], strides = [1, 1, 1]} : vector<16x8x4xf32> to vector<16x7x4xf32>
    %3 = tpu.concatenate %1, %2 in 1 : vector<16x1x4xf32>, vector<16x7x4xf32> -> vector<16x8x4xf32>
    %cst_2 = arith.constant 0.000000e+00 : f32
    %4 = vector.broadcast %cst_2 : f32 to vector<16x1x4xf32>
    %5 = vector.extract_strided_slice %0 {offsets = [0, 1, 0], sizes = [16, 7, 4], strides = [1, 1, 1]} : vector<16x8x4xf32> to vector<16x7x4xf32>
    %6 = tpu.concatenate %5, %4 in 1 : vector<16x7x4xf32>, vector<16x1x4xf32> -> vector<16x8x4xf32>
    %7 = tpu.concatenate %3, %0, %6 in 2 : vector<16x8x4xf32>, vector<16x8x4xf32>, vector<16x8x4xf32> -> vector<16x8x12xf32>
    %8 = vector.shape_cast %7 : vector<16x8x12xf32> to vector<128x12xf32>
    %c0_3 = arith.constant 0 : index
    %c0_4 = arith.constant 0 : index
    %9 = vector.load %arg2[%c0_3, %c0_4] : memref<12x96xf32, #tpu.memory_space<vmem>>, vector<12x96xf32>
    %cst_5 = arith.constant dense<0.000000e+00> : vector<128x96xf32>
    %10 = tpu.matmul %8, %9, %cst_5 {dimension_numbers = #tpu.dot_dimension_numbers<[1], [0], [0], [1], [0, 0, 1, 1], [], []>} : vector<128x12xf32>, vector<12x96xf32>, vector<128x96xf32> -> vector<128x96xf32>
    %c0_6 = arith.constant 0 : index
    %c0_7 = arith.constant 0 : index
    %11 = vector.load %arg3[%c0_6, %c0_7] : memref<1x96xf32, #tpu.memory_space<vmem>>, vector<1x96xf32>
    %12 = vector.broadcast %11 : vector<1x96xf32> to vector<128x96xf32>
    %13 = arith.addf %10, %12 : vector<128x96xf32>
    %14 = vector.extract_strided_slice %13 {offsets = [0, 0], sizes = [128, 32], strides = [1, 1]} : vector<128x96xf32> to vector<128x32xf32>
    %15 = vector.extract_strided_slice %13 {offsets = [0, 32], sizes = [128, 32], strides = [1, 1]} : vector<128x96xf32> to vector<128x32xf32>
    %16 = vector.extract_strided_slice %13 {offsets = [0, 64], sizes = [128, 32], strides = [1, 1]} : vector<128x96xf32> to vector<128x32xf32>
    %17 = arith.negf %15 : vector<128x32xf32>
    %18 = math.exp %17 : vector<128x32xf32>
    %cst_8 = arith.constant 1.000000e+00 : f32
    %19 = vector.broadcast %cst_8 : f32 to vector<128x32xf32>
    %20 = arith.addf %19, %18 : vector<128x32xf32>
    %21 = arith.divf %19, %20 : vector<128x32xf32>
    %22 = arith.addf %14, %21 : vector<128x32xf32>
    %23 = arith.addf %22, %16 : vector<128x32xf32>
    %cst_9 = arith.constant 0.000000e+00 : f32
    %24 = vector.broadcast %cst_9 : f32 to vector<128x32xf32>
    %25 = arith.maximumf %23, %24 : vector<128x32xf32>
    %c0_10 = arith.constant 0 : index
    %c0_11 = arith.constant 0 : index
    %26 = vector.load %arg4[%c0_10, %c0_11] : memref<128x32xf32, #tpu.memory_space<vmem>>, vector<128x32xf32>
    tpu.vector_store %arg4[%c0_10, %c0_11], %25 {strides = array<i32>} : memref<128x32xf32, #tpu.memory_space<vmem>>, vector<128x32xf32>,
    return
  }
  func.func @transform_0(%arg0: i32) -> (i32, i32, i32) {
    %c0_i32 = arith.constant 0 : i32
    %c0_i32_0 = arith.constant 0 : i32
    %c0_i32_1 = arith.constant 0 : i32
    return %arg0, %c0_i32, %c0_i32_0 : i32, i32, i32
  }
  func.func @transform_1(%arg0: i32) -> (i32, i32) {
    %c0_i32 = arith.constant 0 : i32
    %c0_i32_0 = arith.constant 0 : i32
    %c0_i32_1 = arith.constant 0 : i32
    return %c0_i32, %c0_i32_0 : i32, i32
  }
  func.func @transform_2(%arg0: i32) -> (i32, i32) {
    %c0_i32 = arith.constant 0 : i32
    %c0_i32_0 = arith.constant 0 : i32
    %c0_i32_1 = arith.constant 0 : i32
    return %c0_i32, %c0_i32_0 : i32, i32
  }
  func.func @transform_3(%arg0: i32) -> (i32, i32) {
    %c0_i32 = arith.constant 0 : i32
    %c0_i32_0 = arith.constant 0 : i32
    return %arg0, %c0_i32 : i32, i32
  }
}

</mosaic_0001>

<bundles_post_ra>
// kernel: tpu_custom_call.1
= control target key start
LH: loop header
LB: loop body
LE: loop exit
PB: predicated region body
PF: predicated region fallthrough
CT: control target
= control target key end

     0   :  { %s1205_s12 = smov 0   ;;  %s1618_s0 = inlined_call_operand.vmem [shape: f32[32,8,4], index: 0, kind: input, shape index: {}]   ;;  %s1619_s1 = inlined_call_operand.vmem [shape: f32[12,96], index: 1, kind: input, shape index: {}]   ;;  %s1620_s2 = inlined_call_operand.vmem [shape: f32[1,96], index: 2, kind: input, shape index: {}]   ;;  %s1621_s3 = inlined_call_operand.vmem [shape: f32[256,32], index: 3, kind: output, shape index: {}]  }
   0x1 LB: > { %s1002_s13 = sadd.s32 4294967295, %s1179_s12   ;;  %p1006_p0 = scmp.ge.s32.totalorder %s1179_s12, 1  ;;  %s1179_s12 = sphi %s1205_s12, %s13_s12  }
   0x2   : > { %p138_p1 = scmp.lt.s32.totalorder %s1179_s12, 3 }
   0x4   : > { %p139_p2 = pnand %p1006_p0, %p138_p1 }
   0x5   : > { %s1007_s14 = sshll.u32 (!%p139_p2), %s1002_s13, 4  ;;  %s1181_s23 = smov (!%p139_p2), 4  }
   0x6   : > { %142 = sbr.rel (%p139_p2) target bundleno = 552 (0x228), region = 32  ;;  %p163_p3 = scmp.lt.s32.totalorder (!%p139_p2), %s1007_s14, 31 }
   0x7   : > { %s1182_s24 = smov (!%p139_p2), 8   ;;  %s1183_s27 = smov (!%p139_p2), 64  }
   0x8   : > { %s1184_s28 = smov (!%p139_p2), 96  }
   0xb   : > { %v451_v0 = vld [vmem:[%s1619_s1 + $0x8] sm:$0xf]  ;;  %vm508_vm0 = vcmask 1043456   ;;  %s1623_s14 = smov (!%p163_p3, %s1007_s14), 31  ;;  %v450_v1 = vld [vmem:[%s1619_s1] sm:$0xff]  ;;  %vm287_vm1 = vcmask 1046528  }
   0xc   : > { %1065 = vmatprep.subr.msk.mxu0 %vm508_vm0, %v451_v0  ;;  %1093 = vmatprep.subr.msk.mxu1 %vm508_vm0, %v451_v0  ;;  %s1008_s19 = sshll.u32 %s1623_s14, 3  ;;  %vm238_vm2 = vcmask 1040384   ;;  %vm416_vm3 = vcmask 31744   ;;  %vm433_vm4 = vcmask 64512   ;;  %vm459_vm5 = vcmask 97280  }
   0xd   : > { %1066 = vmatpush3.msk.msra.mxu0 %vm508_vm0, %v451_v0  ;;  %1095 = vmatpush3.msk.msra.mxu1 %vm508_vm0, %v451_v0  ;;  %s1227_s22 = scalar_lea.vmem %s1618_s0, %s1008_s19  ;;  %s1565_s4 = scalar_lea.vmem %s1621_s3, %s1008_s19  ;;  %vm929_vm6 = vcmask 261120  }
   0xe   : > { %1067 = vmatprep.subr.mxu0 %v450_v1  ;;  %1094 = vmatprep.subr.mxu1 %v450_v1  ;;  %v1230_v2 = vld [vmem:[%s1227_s22 + $0x8] sm:$0xff]  ;;  %v1233_v3 = vld [vmem:[%s1227_s22] sm:$0xff]  ;;  %v1262_v14 = vld [vmem:[%s1227_s22 + $0x50] sm:$0xff] }
   0xf   : > { %1068 = vmatpush3.msra.mxu0 %v450_v1  ;;  %1096 = vmatpush3.msra.mxu1 %v450_v1  ;;  %v1240_v4 = vld [vmem:[%s1227_s22 + $0x40] sm:$0xff]  ;;  %v1243_v5 = vld [vmem:[%s1227_s22 + $0x48] sm:$0xff]  ;;  %v255_v7 = vrot.slane %v1233_v3, 1  ;;  %v256_v11 = vrot.slane %v1230_v2, 1  ;;  %v1265_v15 = vld [vmem:[%s1227_s22 + $0x10] sm:$0xff]  ;;  %v265_v18 = vrot.slane %v1262_v14, 1 }
  0x10   : > { %306 = vrot.lane.b32.xlu1 %v1230_v2, %s1181_s23  ;;  %304 = vrot.lane.b32.xlu0 %v1233_v3, %s1181_s23  ;;  %v263_v6 = vrot.slane %v1240_v4, 1  ;;  %v264_v10 = vrot.slane %v1243_v5, 1  ;;  %v1272_v16 = vld [vmem:[%s1227_s22 + $0x58] sm:$0xff]  ;;  %v257_v19 = vrot.slane %v1265_v15, 1  ;;  %v1294_v26 = vld [vmem:[%s1227_s22 + $0x60] sm:$0xff]  ;;  %v206_v52 = vrot.slane %v1233_v3, 7 }
  0x11   : > { %v288_v9 = vsel %vm287_vm1, %v255_v7, 0.0  ;;  %v289_v13 = vsel %vm287_vm1, %v256_v11, 0.0  ;;  %v1275_v17 = vld [vmem:[%s1227_s22 + $0x18] sm:$0xff]  ;;  %v298_v20 = vsel %vm287_vm1, %v265_v18, 0.0  ;;  %v266_v22 = vrot.slane %v1272_v16, 1  ;;  %v1297_v27 = vld [vmem:[%s1227_s22 + $0x20] sm:$0xff] }
  0x12   : > { %v296_v8 = vsel %vm287_vm1, %v263_v6, 0.0  ;;  %v297_v12 = vsel %vm287_vm1, %v264_v10, 0.0  ;;  %v290_v21 = vsel %vm287_vm1, %v257_v19, 0.0  ;;  %v258_v23 = vrot.slane %v1275_v17, 1  ;;  %v1304_v28 = vld [vmem:[%s1227_s22 + $0x68] sm:$0xff]  ;;  %v1326_v38 = vld [vmem:[%s1227_s22 + $0x70] sm:$0xff] }
  0x13   : > { %v299_v24 = vsel %vm287_vm1, %v266_v22, 0.0  ;;  %v1307_v29 = vld [vmem:[%s1227_s22 + $0x28] sm:$0xff]  ;;  %v267_v30 = vrot.slane %v1294_v26, 1  ;;  %v259_v31 = vrot.slane %v1297_v27, 1  ;;  %v268_v34 = vrot.slane %v1304_v28, 1  ;;  %v1329_v39 = vld [vmem:[%s1227_s22 + $0x30] sm:$0xff] }
  0x14   : > { %322 = vrot.lane.b32.xlu1 %v1243_v5, %s1181_s23  ;;  %320 = vrot.lane.b32.xlu0 %v1240_v4, %s1181_s23  ;;  %v291_v25 = vsel %vm287_vm1, %v258_v23, 0.0  ;;  %v260_v35 = vrot.slane %v1307_v29, 1  ;;  %v1336_v40 = vld [vmem:[%s1227_s22 + $0x78] sm:$0xff]  ;;  %v269_v42 = vrot.slane %v1326_v38, 1  ;;  %v261_v43 = vrot.slane %v1329_v39, 1 }
  0x15   : > { %v300_v32 = vsel %vm287_vm1, %v267_v30, 0.0  ;;  %v292_v33 = vsel %vm287_vm1, %v259_v31, 0.0  ;;  %v301_v36 = vsel %vm287_vm1, %v268_v34, 0.0  ;;  %v1339_v41 = vld [vmem:[%s1227_s22 + $0x38] sm:$0xff]  ;;  %v270_v46 = vrot.slane %v1336_v40, 1 }
  0x16   : > { %v293_v37 = vsel %vm287_vm1, %v260_v35, 0.0  ;;  %v302_v44 = vsel %vm287_vm1, %v269_v42, 0.0  ;;  %v294_v45 = vsel %vm287_vm1, %v261_v43, 0.0  ;;  %v262_v47 = vrot.slane %v1339_v41, 1 }
  0x17   : > { %v303_v48 = vsel %vm287_vm1, %v270_v46, 0.0  ;;  %v214_v53 = vrot.slane %v1240_v4, 7  ;;  %v207_v56 = vrot.slane %v1230_v2, 7  ;;  %v215_v57 = vrot.slane %v1243_v5, 7 }
  0x18   : > { %384 = vrot.lane.b32.xlu1 %v296_v8, %s1182_s24  ;;  %368 = vrot.lane.b32.xlu0 %v288_v9, %s1182_s24  ;;  %v295_v49 = vsel %vm287_vm1, %v262_v47, 0.0  ;;  %v239_v58 = vsel %vm238_vm2, 0.0, %v206_v52 }
  0x19   : > { %v247_v59 = vsel %vm238_vm2, 0.0, %v214_v53  ;;  %v240_v0 = vsel %vm238_vm2, 0.0, %v207_v56  ;;  %v248_v1 = vsel %vm238_vm2, 0.0, %v215_v57 }
  0x1c   : > { %386 = vrot.lane.b32.xlu1 %v297_v12, %s1182_s24  ;;  %370 = vrot.lane.b32.xlu0 %v289_v13, %s1182_s24  ;;  %v216_v12 = vrot.slane %v1262_v14, 7  ;;  %v208_v13 = vrot.slane %v1265_v15, 7 }
  0x1e   : > { %v249_v22 = vsel %vm238_vm2, 0.0, %v216_v12  ;;  %v241_v23 = vsel %vm238_vm2, 0.0, %v208_v13 }
  0x20   : > { %324 = vrot.lane.b32.xlu1 %v1262_v14, %s1181_s23  ;;  %308 = vrot.lane.b32.xlu0 %v1265_v15, %s1181_s23 }
  0x24   : > { %326 = vrot.lane.b32.xlu1 %v1272_v16, %s1181_s23  ;;  %310 = vrot.lane.b32.xlu0 %v1275_v17, %s1181_s23 }
  0x28   : > { %388 = vrot.lane.b32.xlu1 %v298_v20, %s1182_s24  ;;  %372 = vrot.lane.b32.xlu0 %v290_v21, %s1182_s24  ;;  %v217_v20 = vrot.slane %v1272_v16, 7  ;;  %v209_v21 = vrot.slane %v1275_v17, 7 }
  0x2a   : > { %v250_v14 = vsel %vm238_vm2, 0.0, %v217_v20  ;;  %v242_v15 = vsel %vm238_vm2, 0.0, %v209_v21 }
  0x2c   : > { %390 = vrot.lane.b32.xlu1 %v299_v24, %s1182_s24  ;;  %374 = vrot.lane.b32.xlu0 %v291_v25, %s1182_s24 }
  0x30   : > { %328 = vrot.lane.b32.xlu1 %v1294_v26, %s1181_s23  ;;  %312 = vrot.lane.b32.xlu0 %v1297_v27, %s1181_s23 }
  0x34   : > { %330 = vrot.lane.b32.xlu1 %v1304_v28, %s1181_s23  ;;  %314 = vrot.lane.b32.xlu0 %v1307_v29, %s1181_s23 }
  0x38   : > { %392 = vrot.lane.b32.xlu1 %v300_v32, %s1182_s24  ;;  %376 = vrot.lane.b32.xlu0 %v292_v33, %s1182_s24 }
  0x3c   : > { %394 = vrot.lane.b32.xlu1 %v301_v36, %s1182_s24  ;;  %378 = vrot.lane.b32.xlu0 %v293_v37, %s1182_s24 }
  0x40   : > { %332 = vrot.lane.b32.xlu1 %v1326_v38, %s1181_s23  ;;  %316 = vrot.lane.b32.xlu0 %v1329_v39, %s1181_s23 }
  0x44   : > { %334 = vrot.lane.b32.xlu1 %v1336_v40, %s1181_s23  ;;  %318 = vrot.lane.b32.xlu0 %v1339_v41, %s1181_s23 }
  0x48   : > { %396 = vrot.lane.b32.xlu1 %v302_v44, %s1182_s24  ;;  %380 = vrot.lane.b32.xlu0 %v294_v45, %s1182_s24  ;;  %v218_v44 = vrot.slane %v1294_v26, 7  ;;  %v210_v45 = vrot.slane %v1297_v27, 7 }
  0x4c   : > { %398 = vrot.lane.b32.xlu1 %v303_v48, %s1182_s24  ;;  %382 = vrot.lane.b32.xlu0 %v295_v49, %s1182_s24  ;;  %v219_v48 = vrot.slane %v1304_v28, 7  ;;  %v211_v49 = vrot.slane %v1307_v29, 7 }
  0x4e   : > { %v252_v26 = vsel %vm238_vm2, 0.0, %v219_v48  ;;  %v244_v27 = vsel %vm238_vm2, 0.0, %v211_v49 }
  0x82   : > { %v307_v50 = vpop.permute.xlu1 %306  ;;  %v305_v51 = vpop.permute.xlu0 %304 }
  0x83   : > { %v417_v60 = vsel %vm416_vm3, %v239_v58, %v305_v51  ;;  %v418_v4 = vsel %vm416_vm3, %v240_v0, %v307_v50  ;;  %v251_v50 = vsel %vm238_vm2, 0.0, %v218_v44  ;;  %v243_v51 = vsel %vm238_vm2, 0.0, %v210_v45 }
  0x84   : > { %v220_v0 = vrot.slane %v1326_v38, 7 }
  0x86   : > { %v323_v54 = vpop.permute.xlu1 %322  ;;  %v321_v55 = vpop.permute.xlu0 %320 }
  0x87   : > { %v425_v61 = vsel %vm416_vm3, %v247_v59, %v321_v55  ;;  %v426_v5 = vsel %vm416_vm3, %v248_v1, %v323_v54  ;;  %v212_v1 = vrot.slane %v1329_v39, 7 }
  0x8a   : > { %v385_v62 = vpop.permute.xlu1 %384  ;;  %v369_v63 = vpop.permute.xlu0 %368 }
  0x8b   : > { %v434_v2 = vsel %vm433_vm4, %v417_v60, %v369_v63  ;;  %v442_v3 = vsel %vm433_vm4, %v425_v61, %v385_v62 }
  0x8c   : > { %1069 = vmatprep.mubr.msk.f32.mxu0 %vm459_vm5, %v434_v2  ;;  %1081 = vmatprep.mubr.msk.f32.mxu1 %vm459_vm5, %v442_v3 }
  0x8e   : > { %v387_v6 = vpop.permute.xlu1 %386  ;;  %v371_v7 = vpop.permute.xlu0 %370 }
  0x8f   : > { %v443_v8 = vsel %vm433_vm4, %v426_v5, %v387_v6  ;;  %v435_v9 = vsel %vm433_vm4, %v418_v4, %v371_v7  ;;  %v221_v4 = vrot.slane %v1336_v40, 7  ;;  %v213_v5 = vrot.slane %v1339_v41, 7 }
  0x90   : > { %1070 = vmatmul.mubr.msk.f32.vlgmr.msra.gmra.mxu0 %vm459_vm5, %v435_v9  ;;  %1082 = vmatmul.mubr.msk.f32.vlgmr.msra.gmra.mxu1 %vm459_vm5, %v443_v8  ;;  %v253_v6 = vsel %vm238_vm2, 0.0, %v220_v0  ;;  %v245_v7 = vsel %vm238_vm2, 0.0, %v212_v1 }
  0x91   : > { %v254_v38 = vsel %vm238_vm2, 0.0, %v221_v4  ;;  %v246_v39 = vsel %vm238_vm2, 0.0, %v213_v5 }
  0x92   : > { %v325_v10 = vpop.permute.xlu1 %324  ;;  %v309_v11 = vpop.permute.xlu0 %308 }
  0x93   : > { %v427_v24 = vsel %vm416_vm3, %v249_v22, %v325_v10  ;;  %v419_v25 = vsel %vm416_vm3, %v241_v23, %v309_v11  ;;  %v1440_v22 = vld [vmem:[%s1620_s2] ss:$0 sm:$0xff] }
  0x96   : > { %v327_v18 = vpop.permute.xlu1 %326  ;;  %v311_v19 = vpop.permute.xlu0 %310 }
  0x97   : > { %v428_v17 = vsel %vm416_vm3, %v250_v14, %v327_v18  ;;  %v420_v33 = vsel %vm416_vm3, %v242_v15, %v311_v19 }
  0x9a   : > { %v389_v30 = vpop.permute.xlu1 %388  ;;  %v373_v31 = vpop.permute.xlu0 %372 }
  0x9b   : > { %v444_v32 = vsel %vm433_vm4, %v427_v24, %v389_v30  ;;  %v436_v16 = vsel %vm433_vm4, %v419_v25, %v373_v31 }
  0x9c   : > { %1072 = vmatprep.mubr.msk.f32.mxu0 %vm459_vm5, %v436_v16  ;;  %1084 = vmatprep.mubr.msk.f32.mxu1 %vm459_vm5, %v444_v32 }
  0x9e   : > { %v391_v34 = vpop.permute.xlu1 %390  ;;  %v375_v35 = vpop.permute.xlu0 %374 }
  0x9f   : > { %v445_v36 = vsel %vm433_vm4, %v428_v17, %v391_v34  ;;  %v437_v37 = vsel %vm433_vm4, %v420_v33, %v375_v35 }
  0xa0   : > { %1073 = vmatmul.mubr.msk.f32.gmra.mxu0 %vm459_vm5, %v437_v37  ;;  %1085 = vmatmul.mubr.msk.f32.gmra.mxu1 %vm459_vm5, %v445_v36 }
  0xa2   : > { %v329_v42 = vpop.permute.xlu1 %328  ;;  %v313_v43 = vpop.permute.xlu0 %312 }
  0xa3   : > { %v429_v52 = vsel %vm416_vm3, %v251_v50, %v329_v42  ;;  %v421_v53 = vsel %vm416_vm3, %v243_v51, %v313_v43 }
  0xa6   : > { %v331_v46 = vpop.permute.xlu1 %330  ;;  %v315_v47 = vpop.permute.xlu0 %314 }
  0xa7   : > { %v430_v29 = vsel %vm416_vm3, %v252_v26, %v331_v46  ;;  %v422_v57 = vsel %vm416_vm3, %v244_v27, %v315_v47 }
  0xaa   : > { %v393_v54 = vpop.permute.xlu1 %392  ;;  %v377_v55 = vpop.permute.xlu0 %376 }
  0xab   : > { %v446_v56 = vsel %vm433_vm4, %v429_v52, %v393_v54  ;;  %v438_v28 = vsel %vm433_vm4, %v421_v53, %v377_v55 }
  0xac   : > { %1075 = vmatprep.mubr.msk.f32.mxu0 %vm459_vm5, %v438_v28  ;;  %1087 = vmatprep.mubr.msk.f32.mxu1 %vm459_vm5, %v446_v56 }
  0xae   : > { %v395_v58 = vpop.permute.xlu1 %394  ;;  %v379_v59 = vpop.permute.xlu0 %378 }
  0xaf   : > { %v447_v60 = vsel %vm433_vm4, %v430_v29, %v395_v58  ;;  %v439_v61 = vsel %vm433_vm4, %v422_v57, %v379_v59 }
  0xb0   : > { %1076 = vmatmul.mubr.msk.f32.gmra.mxu0 %vm459_vm5, %v439_v61  ;;  %1088 = vmatmul.mubr.msk.f32.gmra.mxu1 %vm459_vm5, %v447_v60 }
  0xb2   : > { %v333_v62 = vpop.permute.xlu1 %332  ;;  %v317_v63 = vpop.permute.xlu0 %316 }
  0xb3   : > { %v431_v8 = vsel %vm416_vm3, %v253_v6, %v333_v62  ;;  %v423_v9 = vsel %vm416_vm3, %v245_v7, %v317_v63 }
  0xb6   : > { %v335_v2 = vpop.permute.xlu1 %334  ;;  %v319_v3 = vpop.permute.xlu0 %318 }
  0xb7   : > { %v432_v41 = vsel %vm416_vm3, %v254_v38, %v335_v2  ;;  %v424_v13 = vsel %vm416_vm3, %v246_v39, %v319_v3 }
  0xba   : > { %v397_v10 = vpop.permute.xlu1 %396  ;;  %v381_v11 = vpop.permute.xlu0 %380 }
  0xbb   : > { %v448_v12 = vsel %vm433_vm4, %v431_v8, %v397_v10  ;;  %v440_v40 = vsel %vm433_vm4, %v423_v9, %v381_v11 }
  0xbc   : > { %1078 = vmatprep.mubr.msk.f32.mxu0 %vm459_vm5, %v440_v40  ;;  %1090 = vmatprep.mubr.msk.f32.mxu1 %vm459_vm5, %v448_v12 }
  0xbe   : > { %v399_v18 = vpop.permute.xlu1 %398  ;;  %v383_v19 = vpop.permute.xlu0 %382 }
  0xbf   : > { %v449_v20 = vsel %vm433_vm4, %v432_v41, %v399_v18  ;;  %v441_v21 = vsel %vm433_vm4, %v424_v13, %v383_v19 }
  0xc0   : > { %1079 = vmatmul.mubr.msk.f32.gmra.mxu0 %vm459_vm5, %v441_v21  ;;  %1091 = vmatmul.mubr.msk.f32.gmra.mxu1 %vm459_vm5, %v449_v20 }
 0x150   : > { %v1071_v23 = vpop.f32.mrf.mxu0  ;;  %v1083_v24 = vpop.f32.mrf.mxu1 }
 0x151   : > { %v1443_v25 = vadd.f32 %v1071_v23, %v1440_v22  ;;  %v1451_v15 = vadd.f32 %v1083_v24, %v1440_v22 }
 0x152   : > { %v578_v30 = vpop.f32.mrf.mxu0  ;;  %v618_v14 = vpop.f32.mrf.mxu1 }
 0x153   : > { %v1446_v31 = vadd.f32 %v1440_v22, %v578_v30  ;;  %851 = vrot.lane.b32.xlu1 %v1443_v25, %s1183_s27  ;;  %v1456_v32 = vadd.f32 %v1440_v22, %v618_v14  ;;  %v1030_v16 = vmul.f32 -1.442695, %v1443_v25  ;;  %v1038_v43 = vmul.f32 -1.442695, %v1451_v15 }
 0x155   : > { %849 = vrot.lane.b32.xlu0 %v1446_v31, %s1183_s27  ;;  %v1029_v35 = vmul.f32 -1.442695, %v1446_v31  ;;  %1109 = vpow2.f32 %v1030_v16  ;;  %v1037_v45 = vmul.f32 -1.442695, %v1456_v32 }
 0x157   : > { %867 = vrot.lane.b32.xlu1 %v1451_v15, %s1183_s27  ;;  %1111 = vpow2.f32 %v1029_v35 }
 0x158   : > { %1113 = vpow2.f32 %v1038_v43 }
 0x159   : > { %865 = vrot.lane.b32.xlu0 %v1456_v32, %s1183_s27  ;;  %1115 = vpow2.f32 %v1037_v45 }
 0x160   : > { %v1074_v17 = vpop.f32.mrf.mxu0  ;;  %v1086_v33 = vpop.f32.mrf.mxu1 }
 0x161   : > { %v1464_v34 = vadd.f32 %v1074_v17, %v1440_v22  ;;  %v1474_v44 = vadd.f32 %v1086_v33, %v1440_v22 }
 0x162   : > { %v588_v36 = vpop.f32.mrf.mxu0  ;;  %v628_v42 = vpop.f32.mrf.mxu1 }
 0x163   : > { %v1468_v37 = vadd.f32 %v1440_v22, %v588_v36  ;;  %855 = vrot.lane.b32.xlu1 %v1464_v34, %s1183_s27  ;;  %v1480_v46 = vadd.f32 %v1440_v22, %v628_v42  ;;  %v1032_v47 = vmul.f32 -1.442695, %v1464_v34  ;;  %v1040_v49 = vmul.f32 -1.442695, %v1474_v44  ;;  %v1110_v53 = vpop.eup %1109 }
 0x164   : > { %v1112_v56 = vpop.eup %1111  ;;  %v706_v58 = vadd.f32 1.0, %v1110_v53 }
 0x165   : > { %853 = vrot.lane.b32.xlu0 %v1468_v37, %s1183_s27  ;;  %v1031_v48 = vmul.f32 -1.442695, %v1468_v37  ;;  %1117 = vpow2.f32 %v1032_v47  ;;  %v1039_v50 = vmul.f32 -1.442695, %v1480_v46  ;;  %v1114_v61 = vpop.eup %1113  ;;  %v705_v62 = vadd.f32 1.0, %v1112_v56 }
 0x166   : > { %v1116_v0 = vpop.eup %1115  ;;  %v714_v1 = vadd.f32 1.0, %v1114_v61 }
 0x167   : > { %871 = vrot.lane.b32.xlu1 %v1474_v44, %s1183_s27  ;;  %1119 = vpow2.f32 %v1031_v48  ;;  %v713_v3 = vadd.f32 1.0, %v1116_v0 }
 0x168   : > { %1121 = vpow2.f32 %v1040_v49 }
 0x169   : > { %869 = vrot.lane.b32.xlu0 %v1480_v46, %s1183_s27  ;;  %1123 = vpow2.f32 %v1039_v50 }
 0x170   : > { %v1077_v51 = vpop.f32.mrf.mxu0  ;;  %v1089_v52 = vpop.f32.mrf.mxu1 }
 0x171   : > { %v1491_v54 = vadd.f32 %v1077_v51, %v1440_v22  ;;  %v1494_v55 = vadd.f32 %v1089_v52, %v1440_v22 }
 0x172   : > { %v598_v26 = vpop.f32.mrf.mxu0  ;;  %v638_v27 = vpop.f32.mrf.mxu1 }
 0x173   : > { %v1034_v28 = vmul.f32 -1.442695, %v1491_v54  ;;  %v1498_v29 = vadd.f32 %v1440_v22, %v598_v26  ;;  %v1501_v57 = vadd.f32 %v1440_v22, %v638_v27  ;;  %859 = vrot.lane.b32.xlu1 %v1491_v54, %s1183_s27  ;;  %v1042_v59 = vmul.f32 -1.442695, %v1494_v55  ;;  %v1118_v2 = vpop.eup %1117 }
 0x174   : > { %v1120_v4 = vpop.eup %1119  ;;  %v708_v5 = vadd.f32 1.0, %v1118_v2 }
 0x175   : > { %1125 = vpow2.f32 %v1034_v28  ;;  %v1033_v60 = vmul.f32 -1.442695, %v1498_v29  ;;  %857 = vrot.lane.b32.xlu0 %v1498_v29, %s1183_s27  ;;  %v1041_v63 = vmul.f32 -1.442695, %v1501_v57  ;;  %v1122_v6 = vpop.eup %1121  ;;  %v707_v8 = vadd.f32 1.0, %v1120_v4 }
 0x176   : > { %v1124_v7 = vpop.eup %1123  ;;  %v716_v11 = vadd.f32 1.0, %v1122_v6 }
 0x177   : > { %1127 = vpow2.f32 %v1033_v60  ;;  %875 = vrot.lane.b32.xlu1 %v1494_v55, %s1183_s27  ;;  %v715_v12 = vadd.f32 1.0, %v1124_v7 }
 0x178   : > { %1129 = vrcp.f32 %v706_v58 }
 0x179   : > { %1131 = vpow2.f32 %v1042_v59  ;;  %873 = vrot.lane.b32.xlu0 %v1501_v57, %s1183_s27 }
 0x17a   : > { %1133 = vrcp.f32 %v705_v62 }
 0x17b   : > { %1135 = vpow2.f32 %v1041_v63 }
 0x17c   : > { %1137 = vrcp.f32 %v714_v1 }
 0x17d   : > { %1139 = vrcp.f32 %v713_v3 }
 0x17e   : > { %1141 = vrcp.f32 %v708_v5 }
 0x17f   : > { %1143 = vrcp.f32 %v707_v8 }
 0x180   : > { %v1080_v9 = vpop.f32.mrf.mxu0  ;;  %v1092_v10 = vpop.f32.mrf.mxu1  ;;  %1145 = vrcp.f32 %v716_v11 }
 0x181   : > { %v1515_v38 = vadd.f32 %v1080_v9, %v1440_v22  ;;  %v1518_v40 = vadd.f32 %v1092_v10, %v1440_v22  ;;  %1147 = vrcp.f32 %v715_v12 }
 0x182   : > { %v1126_v39 = vpop.eup %1125  ;;  %v608_v41 = vpop.f32.mrf.mxu0 }
 0x183   : > { %v648_v13 = vpop.f32.mrf.mxu1  ;;  %v710_v18 = vadd.f32 1.0, %v1126_v39  ;;  %v1521_v19 = vadd.f32 %v1440_v22, %v608_v41  ;;  %863 = vrot.lane.b32.xlu1 %v1515_v38, %s1183_s27  ;;  %v1036_v30 = vmul.f32 -1.442695, %v1515_v38  ;;  %v1044_v16 = vmul.f32 -1.442695, %v1518_v40 }
 0x184   : > { %v1128_v20 = vpop.eup %1127  ;;  %v1526_v21 = vadd.f32 %v1440_v22, %v648_v13 }
 0x185   : > { %v1130_v23 = vpop.eup %1129  ;;  %v709_v24 = vadd.f32 1.0, %v1128_v20  ;;  %861 = vrot.lane.b32.xlu0 %v1521_v19, %s1183_s27  ;;  %1149 = vrcp.f32 %v710_v18  ;;  %v1035_v33 = vmul.f32 -1.442695, %v1521_v19 }
 0x186   : > { %v1132_v14 = vpop.eup %1131  ;;  %v1043_v35 = vmul.f32 -1.442695, %v1526_v21 }
 0x187   : > { %v1134_v17 = vpop.eup %1133  ;;  %771 = vrot.lane.b32.xlu1 %v1130_v23, %s1184_s28  ;;  %1151 = vrcp.f32 %v709_v24  ;;  %v718_v36 = vadd.f32 1.0, %v1132_v14 }
 0x188   : > { %v1136_v22 = vpop.eup %1135  ;;  %1153 = vpow2.f32 %v1036_v30 }
 0x189   : > { %769 = vrot.lane.b32.xlu0 %v1134_v17, %s1184_s28  ;;  %v1138_v42 = vpop.eup %1137  ;;  %1155 = vpow2.f32 %v1044_v16  ;;  %v717_v43 = vadd.f32 1.0, %v1136_v22 }
 0x18a   : > { %1157 = vpow2.f32 %v1035_v33  ;;  %v1140_v45 = vpop.eup %1139 }
 0x18b   : > { %787 = vrot.lane.b32.xlu1 %v1138_v42, %s1184_s28  ;;  %1159 = vpow2.f32 %v1043_v35  ;;  %v1142_v47 = vpop.eup %1141 }
 0x18c   : > { %1161 = vrcp.f32 %v718_v36  ;;  %v1144_v48 = vpop.eup %1143 }
 0x18d   : > { %785 = vrot.lane.b32.xlu0 %v1140_v45, %s1184_s28  ;;  %1163 = vrcp.f32 %v717_v43  ;;  %v1146_v49 = vpop.eup %1145 }
 0x18e   : > { %v1148_v50 = vpop.eup %1147 }
 0x18f   : > { %775 = vrot.lane.b32.xlu1 %v1142_v47, %s1184_s28 }
 0x191   : > { %773 = vrot.lane.b32.xlu0 %v1144_v48, %s1184_s28 }
 0x192   : > { %v1150_v51 = vpop.eup %1149 }
 0x193   : > { %791 = vrot.lane.b32.xlu1 %v1146_v49, %s1184_s28 }
 0x194   : > { %v1152_v52 = vpop.eup %1151 }
 0x195   : > { %789 = vrot.lane.b32.xlu0 %v1148_v50, %s1184_s28  ;;  %v1154_v53 = vpop.eup %1153 }
 0x196   : > { %v1156_v26 = vpop.eup %1155  ;;  %v712_v27 = vadd.f32 1.0, %v1154_v53 }
 0x197   : > { %779 = vrot.lane.b32.xlu1 %v1150_v51, %s1184_s28  ;;  %v1158_v56 = vpop.eup %1157  ;;  %v720_v58 = vadd.f32 1.0, %v1156_v26 }
 0x198   : > { %v1160_v28 = vpop.eup %1159  ;;  %1165 = vrcp.f32 %v712_v27  ;;  %v711_v59 = vadd.f32 1.0, %v1158_v56 }
 0x199   : > { %777 = vrot.lane.b32.xlu0 %v1152_v52, %s1184_s28  ;;  %v1162_v60 = vpop.eup %1161  ;;  %v719_v61 = vadd.f32 1.0, %v1160_v28 }
 0x19a   : > { %1167 = vrcp.f32 %v711_v59  ;;  %v1164_v62 = vpop.eup %1163 }
 0x19b   : > { %795 = vrot.lane.b32.xlu1 %v1162_v60, %s1184_s28  ;;  %1169 = vrcp.f32 %v720_v58 }
 0x19c   : > { %1171 = vrcp.f32 %v719_v61 }
 0x19d   : > { %793 = vrot.lane.b32.xlu0 %v1164_v62, %s1184_s28 }
 0x1a5   : > { %v1166_v63 = vpop.eup %1165 }
 0x1a6   : > { %783 = vrot.lane.b32.xlu1 %v1166_v63, %s1184_s28 }
 0x1a7   : > { %v1168_v0 = vpop.eup %1167 }
 0x1a8   : > { %781 = vrot.lane.b32.xlu0 %v1168_v0, %s1184_s28  ;;  %v1170_v1 = vpop.eup %1169 }
 0x1a9   : > { %v1172_v2 = vpop.eup %1171 }
 0x1aa   : > { %799 = vrot.lane.b32.xlu1 %v1170_v1, %s1184_s28 }
 0x1ac   : > { %797 = vrot.lane.b32.xlu0 %v1172_v2, %s1184_s28 }
 0x1ae   : > { %879 = vrot.lane.b32.xlu1 %v1518_v40, %s1183_s27 }
 0x1b0   : > { %877 = vrot.lane.b32.xlu0 %v1526_v21, %s1183_s27 }
 0x1c5   : > { %v852_v3 = vpop.permute.xlu1 %851 }
 0x1c7   : > { %v850_v4 = vpop.permute.xlu0 %849 }
 0x1c9   : > { %v868_v5 = vpop.permute.xlu1 %867 }
 0x1cb   : > { %v866_v6 = vpop.permute.xlu0 %865 }
 0x1d5   : > { %v856_v7 = vpop.permute.xlu1 %855 }
 0x1d7   : > { %v854_v8 = vpop.permute.xlu0 %853 }
 0x1d9   : > { %v872_v9 = vpop.permute.xlu1 %871 }
 0x1db   : > { %v870_v10 = vpop.permute.xlu0 %869 }
 0x1e5   : > { %v860_v11 = vpop.permute.xlu1 %859 }
 0x1e7   : > { %v858_v39 = vpop.permute.xlu0 %857 }
 0x1e9   : > { %v876_v12 = vpop.permute.xlu1 %875 }
 0x1eb   : > { %v874_v41 = vpop.permute.xlu0 %873 }
 0x1f5   : > { %v1554_v13 = vpop.permute.xlu1 %863 }
 0x1f7   : > { %v1556_v18 = vpop.permute.xlu0 %861 }
 0x1f9   : > { %v772_v20 = vpop.permute.xlu1 %771 }
 0x1fa   : > { %v818_v23 = vadd.f32 %v772_v20, %v1443_v25 }
 0x1fb   : > { %v770_v24 = vpop.permute.xlu0 %769 }
 0x1fc   : > { %v898_v30 = vadd.f32 %v852_v3, %v818_v23  ;;  %v817_v14 = vadd.f32 %v770_v24, %v1446_v31 }
 0x1fd   : > { %v788_v16 = vpop.permute.xlu1 %787 }
 0x1fe   : > { %v914_v17 = vmax.f32 %v898_v30, 0.0  ;;  %v897_v33 = vadd.f32 %v850_v4, %v817_v14  ;;  %v826_v22 = vadd.f32 %v788_v16, %v1451_v15 }
 0x1ff   : > { %v786_v25 = vpop.permute.xlu0 %785 }
 0x200   : > { %931 = vst.msk [vmem:[%s1565_s4 + $0x8] sm:$0xff] %vm929_vm6, %v914_v17  ;;  %v913_v31 = vmax.f32 %v897_v33, 0.0  ;;  %v906_v35 = vadd.f32 %v868_v5, %v826_v22  ;;  %v825_v36 = vadd.f32 %v786_v25, %v1456_v32 }
 0x201   : > { %v776_v42 = vpop.permute.xlu1 %775 }
 0x202   : > { %930 = vst.msk [vmem:[%s1565_s4] sm:$0xff] %vm929_vm6, %v913_v31  ;;  %v922_v43 = vmax.f32 %v906_v35, 0.0  ;;  %v905_v45 = vadd.f32 %v866_v6, %v825_v36  ;;  %v820_v47 = vadd.f32 %v776_v42, %v1464_v34 }
 0x203   : > { %v774_v48 = vpop.permute.xlu0 %773 }
 0x204   : > { %939 = vst.msk [vmem:[%s1565_s4 + $0x48] sm:$0xff] %vm929_vm6, %v922_v43  ;;  %v921_v15 = vmax.f32 %v905_v45, 0.0  ;;  %v900_v49 = vadd.f32 %v856_v7, %v820_v47  ;;  %v819_v50 = vadd.f32 %v774_v48, %v1468_v37 }
 0x205   : > { %v792_v51 = vpop.permute.xlu1 %791 }
 0x206   : > { %938 = vst.msk [vmem:[%s1565_s4 + $0x40] sm:$0xff] %vm929_vm6, %v921_v15  ;;  %v916_v32 = vmax.f32 %v900_v49, 0.0  ;;  %v899_v52 = vadd.f32 %v854_v8, %v819_v50  ;;  %v828_v53 = vadd.f32 %v792_v51, %v1474_v44 }
 0x207   : > { %v790_v26 = vpop.permute.xlu0 %789 }
 0x208   : > { %933 = vst.msk [vmem:[%s1565_s4 + $0x18] sm:$0xff] %vm929_vm6, %v916_v32  ;;  %v915_v34 = vmax.f32 %v899_v52, 0.0  ;;  %v908_v27 = vadd.f32 %v872_v9, %v828_v53  ;;  %v827_v56 = vadd.f32 %v790_v26, %v1480_v46 }
 0x209   : > { %v780_v28 = vpop.permute.xlu1 %779 }
 0x20a   : > { %932 = vst.msk [vmem:[%s1565_s4 + $0x10] sm:$0xff] %vm929_vm6, %v915_v34  ;;  %v924_v37 = vmax.f32 %v908_v27, 0.0  ;;  %v907_v58 = vadd.f32 %v870_v10, %v827_v56  ;;  %v822_v59 = vadd.f32 %v780_v28, %v1491_v54 }
 0x20b   : > { %v778_v60 = vpop.permute.xlu0 %777 }
 0x20c   : > { %941 = vst.msk [vmem:[%s1565_s4 + $0x58] sm:$0xff] %vm929_vm6, %v924_v37  ;;  %v923_v44 = vmax.f32 %v907_v58, 0.0  ;;  %v902_v61 = vadd.f32 %v860_v11, %v822_v59  ;;  %v821_v62 = vadd.f32 %v778_v60, %v1498_v29 }
 0x20d   : > { %v796_v63 = vpop.permute.xlu1 %795 }
 0x20e   : > { %940 = vst.msk [vmem:[%s1565_s4 + $0x50] sm:$0xff] %vm929_vm6, %v923_v44  ;;  %v918_v46 = vmax.f32 %v902_v61, 0.0  ;;  %v901_v0 = vadd.f32 %v858_v39, %v821_v62  ;;  %v830_v1 = vadd.f32 %v796_v63, %v1494_v55 }
 0x20f   : > { %v794_v2 = vpop.permute.xlu0 %793 }
 0x210   : > { %935 = vst.msk [vmem:[%s1565_s4 + $0x28] sm:$0xff] %vm929_vm6, %v918_v46  ;;  %v917_v54 = vmax.f32 %v901_v0, 0.0  ;;  %v910_v3 = vadd.f32 %v876_v12, %v830_v1  ;;  %v829_v4 = vadd.f32 %v794_v2, %v1501_v57 }
 0x212   : > { %934 = vst.msk [vmem:[%s1565_s4 + $0x20] sm:$0xff] %vm929_vm6, %v917_v54  ;;  %v926_v5 = vmax.f32 %v910_v3, 0.0  ;;  %v909_v29 = vadd.f32 %v874_v41, %v829_v4 }
 0x214   : > { %943 = vst.msk [vmem:[%s1565_s4 + $0x68] sm:$0xff] %vm929_vm6, %v926_v5  ;;  %v925_v6 = vmax.f32 %v909_v29, 0.0 }
 0x216   : > { %942 = vst.msk [vmem:[%s1565_s4 + $0x60] sm:$0xff] %vm929_vm6, %v925_v6 }
 0x218   : > { %v784_v7 = vpop.permute.xlu1 %783 }
 0x219   : > { %v824_v55 = vadd.f32 %v784_v7, %v1515_v38 }
 0x21a   : > { %v782_v8 = vpop.permute.xlu0 %781 }
 0x21b   : > { %v904_v9 = vadd.f32 %v1554_v13, %v824_v55  ;;  %v823_v57 = vadd.f32 %v782_v8, %v1521_v19 }
 0x21c   : > { %v800_v10 = vpop.permute.xlu1 %799 }
 0x21d   : > { %v920_v11 = vmax.f32 %v904_v9, 0.0  ;;  %v903_v39 = vadd.f32 %v1556_v18, %v823_v57  ;;  %v832_v20 = vadd.f32 %v800_v10, %v1518_v40 }
 0x21e   : > { %v798_v12 = vpop.permute.xlu0 %797 }
 0x21f   : > { %937 = vst.msk [vmem:[%s1565_s4 + $0x38] sm:$0xff] %vm929_vm6, %v920_v11  ;;  %v919_v41 = vmax.f32 %v903_v39, 0.0  ;;  %v831_v38 = vadd.f32 %v798_v12, %v1526_v21 }
 0x220   : > { %v880_v23 = vpop.permute.xlu1 %879 }
 0x221   : > { %936 = vst.msk [vmem:[%s1565_s4 + $0x30] sm:$0xff] %vm929_vm6, %v919_v41  ;;  %v912_v13 = vadd.f32 %v880_v23, %v832_v20 }
 0x222   : > { %v878_v24 = vpop.permute.xlu0 %877 }
 0x223   : > { %v928_v30 = vmax.f32 %v912_v13, 0.0  ;;  %v911_v19 = vadd.f32 %v878_v24, %v831_v38 }
 0x225   : > { %945 = vst.msk [vmem:[%s1565_s4 + $0x78] sm:$0xff] %vm929_vm6, %v928_v30  ;;  %v927_v14 = vmax.f32 %v911_v19, 0.0 }
 0x227   : > { %944 = vst.msk [vmem:[%s1565_s4 + $0x70] sm:$0xff] %vm929_vm6, %v927_v14 }
 0x228 PF: > { %s13_s12 = sadd.s32 1, %s1179_s12  }
 0x229   : > { %p10_p4 = scmp.ge.s32.totalorder %s13_s12, 4  }
 0x22b   :  { %12 = sbr.rel (!%p10_p4) target bundleno = 1 (0x1), region = 62 }

</bundles_post_ra>
